<compile_context>
chip_gen: v5e
topology: v5e:2x2
jax: 0.10.0
libtpu: 0.0.40
codegen_flags: <defaults>
</compile_context>

<pallas_src>
import math

import jax
import jax.numpy as jnp
from jax.experimental import pallas as pl
from jax.experimental.pallas import tpu as pltpu

# Stacked fixed-table layout: month(13) | day(32) | weekday(7) | hour(24)
_TEMPORAL_SIZES = (13, 32, 7, 24)
_TEMPORAL_OFFSETS = (0, 13, 45, 52)   # row offset of each feature's sub-table
_K_TAB = 80                           # 76 real rows padded to a multiple of 8


def _sinusoid_table(n, d_model):
    """table[i, 2k] = sin(i * div_k), table[i, 2k+1] = cos(i * div_k).

    Same formula used by PositionalEmbedding (over sequence positions) and by
    every FixedEmbedding (over its vocabulary indices).
    """
    j = jnp.arange(d_model, dtype=jnp.float32)
    par = jnp.mod(j, 2.0)
    freqs = jnp.exp(-(math.log(10000.0) / d_model) * (j - par))
    phase = par * (math.pi / 2.0)
    p = jnp.arange(n, dtype=jnp.float32)[:, None]
    return jnp.sin(p * freqs[None, :] + phase[None, :])


def _data_embedding_kernel(x_ref, mark_ref, w_ref, tab_ref, pos_ref, o_ref):
    # x_ref:   (1, TL, 3*c_in)   [x[t-1] | x[t] | x[t+1]] taps, streamed per tile
    # mark_ref:(1, TL, 4)        int32 marks, pre-offset into the stacked table
    # w_ref:   (3*c_in, d_model) stacked conv taps (grid-invariant, tiny)
    # tab_ref: (K_TAB, d_model)  stacked fixed temporal tables (grid-invariant)
    # pos_ref: (TL, d_model)     positional rows for this tile, streamed
    # o_ref:   (1, TL, d_model)
    tl = o_ref.shape[1]
    k_tab = tab_ref.shape[0]
    hi = jax.lax.Precision.HIGHEST

    # TokenEmbedding: circular Conv1d(c_in, d_model, k=3, no bias) as ONE matmul.
    val = jnp.dot(x_ref[0], w_ref[...],
                  preferred_element_type=jnp.float32, precision=hi)

    # TemporalEmbedding (fixed, freq='h'): four fixed-table lookups as one
    # multi-hot MXU matmul. Marks are pre-offset, so each column directly
    # selects a row of its own sub-table in the stacked table.
    marks = mark_ref[0]                                          # (TL, 4) int32
    r_iota = jax.lax.broadcasted_iota(jnp.int32, (tl, k_tab), 1)
    onehot = jnp.zeros((tl, k_tab), jnp.float32)
    for c in range(marks.shape[1]):                              # 4 features
        onehot = onehot + (r_iota == marks[:, c:c + 1]).astype(jnp.float32)
    temporal = jnp.dot(onehot, tab_ref[...],
                       preferred_element_type=jnp.float32, precision=hi)

    # TODO(synk): nn.Dropout(p=0.1) applied as eval-mode identity (training-mode
    # stochastic masking intentionally omitted).
    o_ref[0] = val + temporal + pos_ref[...]


def _pick_tile(L, B, max_rows=512, min_rows=128, min_steps=8):
    """Largest divisor-of-L tile (multiple of 8, <= max_rows) that keeps the grid
    busy: prefer >= min_steps total grid steps (pipeline / megacore), but never
    shrink below min_rows just to manufacture steps (per-step overhead wins)."""
    cands = [t for t in range(min(L, max_rows), 0, -1)
             if L % t == 0 and t % 8 == 0]
    if not cands:
        return L            # L not a multiple of 8: single full-length tile
    for t in cands:         # descending
        if t <= min_rows or B * (L // t) >= min_steps:
            return t
    return cands[-1]


def data_embedding(x, x_mark, w_conv, *, tl=None):
    """DataEmbedding forward (embed_type='fixed', freq='h', eval-mode dropout).

    x:      (B, L, c_in)       float32
    x_mark: (B, L, 4)          integer-valued [month, day, weekday, hour] floats
    w_conv: (d_model, c_in, 3) float32 Conv1d weight
    returns (B, L, d_model)    float32
    """
    B, L, c_in = x.shape
    d_model = w_conv.shape[0]
    assert d_model % 128 == 0, "d_model must be a multiple of 128 (lane-dense stores)"
    assert x_mark.shape == (B, L, len(_TEMPORAL_OFFSETS)), \
        "expected 4 time marks (embed_type='fixed', freq='h')"

    if tl is None:
        tl = _pick_tile(L, B)
    assert L % tl == 0 and (tl % 8 == 0 or tl == L), "bad L tile"

    # Circular Conv1d folded into one matmul: tap k=0 multiplies x[t-1], k=1
    # multiplies x[t], k=2 multiplies x[t+1] (padding=1, padding_mode='circular').
    x_taps = jnp.concatenate(
        [jnp.roll(x, 1, axis=1), x, jnp.roll(x, -1, axis=1)], axis=-1)
    w_taps = jnp.concatenate(
        [jnp.transpose(w_conv[:, :, k]) for k in range(3)], axis=0)

    # Stacked fixed temporal tables, zero-padded to a sublane-aligned row count
    # (padded rows are never selected). Marks cast with .long() semantics and
    # pre-offset into the stacked row space in the wrapper.
    tables = jnp.concatenate(
        [_sinusoid_table(n, d_model) for n in _TEMPORAL_SIZES], axis=0)
    tables = jnp.pad(tables, ((0, _K_TAB - tables.shape[0]), (0, 0)))
    marks = (x_mark.astype(jnp.int32)
             + jnp.asarray(_TEMPORAL_OFFSETS, jnp.int32)[None, None, :])

    # Positional table pe[:L]; streamed per L-tile (never fully VMEM-resident).
    pos = _sinusoid_table(L, d_model)

    grid = (B, L // tl)
    tile3 = lambda b, l: (b, l, 0)
    const2 = lambda b, l: (0, 0)

    return pl.pallas_call(
        _data_embedding_kernel,
        out_shape=jax.ShapeDtypeStruct((B, L, d_model), jnp.float32),
        grid_spec=pltpu.PrefetchScalarGridSpec(
            num_scalar_prefetch=0,
            grid=grid,
            in_specs=[
                pl.BlockSpec((1, tl, 3 * c_in), tile3),            # conv taps of x
                pl.BlockSpec((1, tl, marks.shape[2]), tile3),      # offset marks
                pl.BlockSpec((3 * c_in, d_model), const2),         # stacked weight
                pl.BlockSpec((_K_TAB, d_model), const2),           # fixed tables
                pl.BlockSpec((tl, d_model), lambda b, l: (l, 0)),  # pos rows
            ],
            out_specs=pl.BlockSpec((1, tl, d_model), tile3),
        ),
        compiler_params=pltpu.CompilerParams(
            dimension_semantics=("parallel", "parallel")),
    )(x_taps, marks, w_taps, tables, pos)


def _reference(x, x_mark, w_conv):
    """Pure-JAX replica of the PyTorch forward (eval mode)."""
    hi = jax.lax.Precision.HIGHEST
    B, L, c_in = x.shape
    d_model = w_conv.shape[0]
    val = (jnp.einsum('blc,dc->bld', jnp.roll(x, 1, axis=1), w_conv[:, :, 0],
                      precision=hi)
           + jnp.einsum('blc,dc->bld', x, w_conv[:, :, 1], precision=hi)
           + jnp.einsum('blc,dc->bld', jnp.roll(x, -1, axis=1), w_conv[:, :, 2],
                        precision=hi))
    idx = x_mark.astype(jnp.int32)   # matches PyTorch .long() truncation
    temporal = jnp.zeros((B, L, d_model), jnp.float32)
    for c, n in enumerate(_TEMPORAL_SIZES):
        temporal = temporal + _sinusoid_table(n, d_model)[idx[:, :, c]]
    pos = _sinusoid_table(L, d_model)
    return val + temporal + pos[None]


if __name__ == "__main__":
    # Small but representative: c_in=7 (Autoformer ETT), d_model=128 (lane-dense),
    # L=64 with tl=16 so the multi-tile grid and per-tile streaming paths run.
    # (Real shapes: leave tl=None; _pick_tile targets >=128-row tiles.)
    B, L, c_in, d_model = 2, 64, 7, 128

    key = jax.random.PRNGKey(0)
    kx, kw, km0, km1, km2, km3 = jax.random.split(key, 6)

    x = jax.random.normal(kx, (B, L, c_in), dtype=jnp.float32)

    # Integer-valued time features stored as float (freq='h' dataloader):
    month = jax.random.randint(km0, (B, L), 0, 13)
    day = jax.random.randint(km1, (B, L), 0, 32)
    weekday = jax.random.randint(km2, (B, L), 0, 7)
    hour = jax.random.randint(km3, (B, L), 0, 24)
    x_mark = jnp.stack([month, day, weekday, hour], axis=-1).astype(jnp.float32)

    # Conv1d weight (d_model, c_in, 3), kaiming-normal fan_in style init.
    fan_in = c_in * 3
    w_conv = (jax.random.normal(kw, (d_model, c_in, 3), dtype=jnp.float32)
              * math.sqrt(2.0 / fan_in))

    ref = _reference(x, x_mark, w_conv)

    out = jax.block_until_ready(data_embedding(x, x_mark, w_conv, tl=16))
    assert out.shape == (B, L, d_model)
    assert jnp.allclose(out, ref, atol=1e-4, rtol=1e-4), "mismatch (tl=16)"

    # Auto-picked tile path (what real sequence lengths would use).
    out2 = jax.block_until_ready(data_embedding(x, x_mark, w_conv))
    assert jnp.allclose(out2, ref, atol=1e-4, rtol=1e-4), "mismatch (auto tl)"

    print("KERNEL_OK")
</pallas_src>

<mosaic_0001>
module attributes {stable_mosaic.version = 11 : i64} {
  func.func @_data_embedding_kernel(%arg0: i32, %arg1: i32, %arg2: memref<1x16x21xf32, #tpu.memory_space<vmem>>, %arg3: memref<1x16x4xi32, #tpu.memory_space<vmem>>, %arg4: memref<21x128xf32, #tpu.memory_space<vmem>>, %arg5: memref<80x128xf32, #tpu.memory_space<vmem>>, %arg6: memref<16x128xf32, #tpu.memory_space<vmem>>, %arg7: memref<1x16x128xf32, #tpu.memory_space<vmem>>) attributes {dimension_semantics = [#tpu.dimension_semantics<parallel>, #tpu.dimension_semantics<parallel>], iteration_bounds = array<i64: 2, 4>, scalar_prefetch = 0 : i64, scratch_operands = 0 : i64, tpu.core_type = #tpu.core_type<tc>, window_params = [{transform_indices = @transform_0, window_bounds = array<i64: 1, 16, 21>}, {transform_indices = @transform_1, window_bounds = array<i64: 1, 16, 4>}, {pipeline_mode = #tpu.pipeline_mode<synchronous>, transform_indices = @transform_2, window_bounds = array<i64: 21, 128>}, {pipeline_mode = #tpu.pipeline_mode<synchronous>, transform_indices = @transform_3, window_bounds = array<i64: 80, 128>}, {transform_indices = @transform_4, window_bounds = array<i64: 16, 128>}, {transform_indices = @transform_5, window_bounds = array<i64: 1, 16, 128>}]} {
    %c0 = arith.constant 0 : index
    %c0_0 = arith.constant 0 : index
    %c0_1 = arith.constant 0 : index
    %0 = vector.load %arg2[%c0, %c0_0, %c0_1] : memref<1x16x21xf32, #tpu.memory_space<vmem>>, vector<1x16x21xf32>
    %1 = vector.shape_cast %0 : vector<1x16x21xf32> to vector<16x21xf32>
    %c0_2 = arith.constant 0 : index
    %c0_3 = arith.constant 0 : index
    %2 = vector.load %arg4[%c0_2, %c0_3] : memref<21x128xf32, #tpu.memory_space<vmem>>, vector<21x128xf32>
    %cst = arith.constant dense<0.000000e+00> : vector<16x128xf32>
    %3 = tpu.matmul %1, %2, %cst {dimension_numbers = #tpu.dot_dimension_numbers<[1], [0], [0], [1], [0, 0, 1, 1], [], []>, precision = #tpu.contract_precision<fp32>} : vector<16x21xf32>, vector<21x128xf32>, vector<16x128xf32> -> vector<16x128xf32>
    %c0_4 = arith.constant 0 : index
    %c0_5 = arith.constant 0 : index
    %c0_6 = arith.constant 0 : index
    %4 = vector.load %arg3[%c0_4, %c0_5, %c0_6] : memref<1x16x4xi32, #tpu.memory_space<vmem>>, vector<1x16x4xi32>
    %5 = vector.shape_cast %4 : vector<1x16x4xi32> to vector<16x4xi32>
    %6 = tpu.iota {dimensions = array<i32: 1>} : vector<16x80xi32>
    %cst_7 = arith.constant 0.000000e+00 : f32
    %7 = vector.broadcast %cst_7 : f32 to vector<16x80xf32>
    %8 = vector.extract_strided_slice %5 {offsets = [0, 0], sizes = [16, 1], strides = [1, 1]} : vector<16x4xi32> to vector<16x1xi32>
    %9 = vector.broadcast %8 : vector<16x1xi32> to vector<16x80xi32>
    %10 = arith.cmpi eq, %6, %9 : vector<16x80xi32>
    %11 = arith.extui %10 : vector<16x80xi1> to vector<16x80xi32>
    %12 = arith.sitofp %11 : vector<16x80xi32> to vector<16x80xf32>
    %13 = arith.addf %7, %12 : vector<16x80xf32>
    %14 = vector.extract_strided_slice %5 {offsets = [0, 1], sizes = [16, 1], strides = [1, 1]} : vector<16x4xi32> to vector<16x1xi32>
    %15 = vector.broadcast %14 : vector<16x1xi32> to vector<16x80xi32>
    %16 = arith.cmpi eq, %6, %15 : vector<16x80xi32>
    %17 = arith.extui %16 : vector<16x80xi1> to vector<16x80xi32>
    %18 = arith.sitofp %17 : vector<16x80xi32> to vector<16x80xf32>
    %19 = arith.addf %13, %18 : vector<16x80xf32>
    %20 = vector.extract_strided_slice %5 {offsets = [0, 2], sizes = [16, 1], strides = [1, 1]} : vector<16x4xi32> to vector<16x1xi32>
    %21 = vector.broadcast %20 : vector<16x1xi32> to vector<16x80xi32>
    %22 = arith.cmpi eq, %6, %21 : vector<16x80xi32>
    %23 = arith.extui %22 : vector<16x80xi1> to vector<16x80xi32>
    %24 = arith.sitofp %23 : vector<16x80xi32> to vector<16x80xf32>
    %25 = arith.addf %19, %24 : vector<16x80xf32>
    %26 = vector.extract_strided_slice %5 {offsets = [0, 3], sizes = [16, 1], strides = [1, 1]} : vector<16x4xi32> to vector<16x1xi32>
    %27 = vector.broadcast %26 : vector<16x1xi32> to vector<16x80xi32>
    %28 = arith.cmpi eq, %6, %27 : vector<16x80xi32>
    %29 = arith.extui %28 : vector<16x80xi1> to vector<16x80xi32>
    %30 = arith.sitofp %29 : vector<16x80xi32> to vector<16x80xf32>
    %31 = arith.addf %25, %30 : vector<16x80xf32>
    %c0_8 = arith.constant 0 : index
    %c0_9 = arith.constant 0 : index
    %32 = vector.load %arg5[%c0_8, %c0_9] : memref<80x128xf32, #tpu.memory_space<vmem>>, vector<80x128xf32>
    %cst_10 = arith.constant dense<0.000000e+00> : vector<16x128xf32>
    %33 = tpu.matmul %31, %32, %cst_10 {dimension_numbers = #tpu.dot_dimension_numbers<[1], [0], [0], [1], [0, 0, 1, 1], [], []>, precision = #tpu.contract_precision<fp32>} : vector<16x80xf32>, vector<80x128xf32>, vector<16x128xf32> -> vector<16x128xf32>
    %34 = arith.addf %3, %33 : vector<16x128xf32>
    %c0_11 = arith.constant 0 : index
    %c0_12 = arith.constant 0 : index
    %35 = vector.load %arg6[%c0_11, %c0_12] : memref<16x128xf32, #tpu.memory_space<vmem>>, vector<16x128xf32>
    %36 = arith.addf %34, %35 : vector<16x128xf32>
    %c0_13 = arith.constant 0 : index
    %c0_14 = arith.constant 0 : index
    %c0_15 = arith.constant 0 : index
    %37 = vector.load %arg7[%c0_13, %c0_14, %c0_15] : memref<1x16x128xf32, #tpu.memory_space<vmem>>, vector<1x16x128xf32>
    %38 = vector.shape_cast %37 : vector<1x16x128xf32> to vector<16x128xf32>
    %39 = vector.shape_cast %36 : vector<16x128xf32> to vector<1x16x128xf32>
    tpu.vector_store %arg7[%c0_13, %c0_14, %c0_15], %39 {strides = array<i32>} : memref<1x16x128xf32, #tpu.memory_space<vmem>>, vector<1x16x128xf32>,
    return
  }
  func.func @transform_0(%arg0: i32, %arg1: i32) -> (i32, i32, i32) {
    %c0_i32 = arith.constant 0 : i32
    %c0_i32_0 = arith.constant 0 : i32
    return %arg0, %arg1, %c0_i32 : i32, i32, i32
  }
  func.func @transform_1(%arg0: i32, %arg1: i32) -> (i32, i32, i32) {
    %c0_i32 = arith.constant 0 : i32
    %c0_i32_0 = arith.constant 0 : i32
    return %arg0, %arg1, %c0_i32 : i32, i32, i32
  }
  func.func @transform_2(%arg0: i32, %arg1: i32) -> (i32, i32) {
    %c0_i32 = arith.constant 0 : i32
    %c0_i32_0 = arith.constant 0 : i32
    %c0_i32_1 = arith.constant 0 : i32
    return %c0_i32, %c0_i32_0 : i32, i32
  }
  func.func @transform_3(%arg0: i32, %arg1: i32) -> (i32, i32) {
    %c0_i32 = arith.constant 0 : i32
    %c0_i32_0 = arith.constant 0 : i32
    %c0_i32_1 = arith.constant 0 : i32
    return %c0_i32, %c0_i32_0 : i32, i32
  }
  func.func @transform_4(%arg0: i32, %arg1: i32) -> (i32, i32) {
    %c0_i32 = arith.constant 0 : i32
    %c0_i32_0 = arith.constant 0 : i32
    return %arg1, %c0_i32 : i32, i32
  }
  func.func @transform_5(%arg0: i32, %arg1: i32) -> (i32, i32, i32) {
    %c0_i32 = arith.constant 0 : i32
    %c0_i32_0 = arith.constant 0 : i32
    return %arg0, %arg1, %c0_i32 : i32, i32, i32
  }
}

</mosaic_0001>

<bundles_post_ra>
// kernel: tpu_custom_call.1
= control target key start
LH: loop header
LB: loop body
LE: loop exit
PB: predicated region body
PF: predicated region fallthrough
CT: control target
= control target key end

     0   :  { %10 = vsyncpa [#allocation3], 0  ;;  %s1621_s0 = inlined_call_operand.vmem [shape: f32[2,64,21], index: 0, kind: input, shape index: {}]   ;;  %s1622_s1 = inlined_call_operand.vmem [shape: s32[2,64,4], index: 1, kind: input, shape index: {}]   ;;  %s1623_s2 = inlined_call_operand.vmem [shape: f32[21,128], index: 2, kind: input, shape index: {}]   ;;  %s1624_s3 = inlined_call_operand.vmem [shape: f32[80,128], index: 3, kind: input, shape index: {}]   ;;  %s1625_s4 = inlined_call_operand.vmem [shape: f32[64,128], index: 4, kind: input, shape index: {}]   ;;  %s1626_s5 = inlined_call_operand.hbm [shape: f32[2,64,128], index: 5, kind: output, shape index: {}]  }
   0x1   :  { %12 = vsyncpa [#allocation3 + $0x1], 0  ;;  %s1286_s18 = smov 0   ;;  %s1288_s19 = smov 0  }
   0x2   :  { %s1290_s20 = smov 0   ;;  %s1292_s21 = smov 0  }
   0x3   :  { %s1294_s22 = smov 0   ;;  %s1296_s23 = smov 0  }
   0x4   :  { %s1298_s24 = smov 0   ;;  %s1300_s25 = smov 0  }
   0x5 LB: > { %s1038_s26 = sadd.s32 4294967295, %s1247_s25   ;;  %s1039_s27 = sadd.s32 4294967294, %s1247_s25   ;;  %s1247_s25 = sphi %s1300_s25, %s18_s25   ;;  %s1243_s24 = sphi %s1298_s24, %s1635_s24   ;;  %s1239_s23 = sphi %s1296_s23, %s1634_s23   ;;  %s1235_s22 = sphi %s1294_s22, %s1633_s22   ;;  %s1231_s21 = sphi %s1292_s21, %s1632_s21   ;;  %s1227_s20 = sphi %s1290_s20, %s1631_s20   ;;  %s1223_s19 = sphi %s1288_s19, %s1630_s19   ;;  %s1219_s18 = sphi %s1286_s18, %s1629_s18  }
   0x6   : > { %s27_s28 = sadd.s32 1, %s1239_s23  ;;  %s30_s29 = sadd.s32 1, %s1243_s24 }
   0x7   : > { %p28_p0 = scmp.ge.s32.totalorder %s27_s28, 4  ;;  %p173_p1 = scmp.ne.s32.totalorder %s1227_s20, %s1223_s19 }
   0x8   : > { %p174_p2 = scmp.eq.s32.totalorder %s1038_s26, 7  ;;  %p179_p5 = scmp.ne.s32.totalorder %s1223_s19, %s1219_s18 }
   0x9   : > { %s1637_s28 = smov (%p28_p0, %s27_s28), 0  ;;  %s1639_s29 = smov (!%p28_p0, %s30_s29), %s1243_s24 }
   0xa   : > { %s159_s30 = ssub.s32 %s1239_s23, %s1637_s28  ;;  %p1337_p3 = por %p174_p2, %p173_p1 }
   0xb   : > { %p32_p4 = scmp.ge.s32.totalorder %s1639_s29, 2  ;;  %p180_p6 = scmp.eq.s32.totalorder %s1039_s27, 7 }
   0xc   : > { %p1042_p7 = scmp.ge.s32.totalorder %s1247_s25, 1  ;;  %p239_p9 = scmp.lt.s32.totalorder %s1247_s25, 9 }
   0xd   : > { %s1641_s29 = smov (%p32_p4, %s1639_s29), 0  ;;  %p1346_p8 = por %p180_p6, %p179_p5 }
   0xe   : > { %s158_s8 = ssub.s32 %s1243_s24, %s1641_s29  ;;  %s163_s9 = sadd.s32 1, %s1227_s20 }
   0xf   : > { %s160_s10 = sor.u32 %s159_s30, %s158_s8  ;;  %p240_p10 = pnand %p1042_p7, %p239_p9 }
  0x10   : > { %p161_p11 = scmp.eq.s32.totalorder %s160_s10, 0  ;;  %s1358_s12 = sshll.u32 (!%p240_p10), %s1231_s21, 1 }
  0x11   : > { %243 = sbr.rel (%p240_p10) target bundleno = 352 (0x160), region = 40  ;;  %p286_p12 = scmp.lt.s32.totalorder (!%p240_p10), %s1235_s22, 1 }
  0x12   : > { %s1355_s11 = scalar_select %p161_p11, %s1227_s20, %s163_s9  }
  0x13   : > { %p288_p13 = scmp.lt.s32.totalorder (!%p240_p10), %s1358_s12, 7  ;;  %s282_s9 = sand.u32 (!%p240_p10), 1, %s1223_s19  }
  0x14   : > { %s1043_s26 = sshll.u32 (!%p240_p10), %s282_s9, 4 }
  0x16   : > { %v1249_v0 = vmov 2   ;;  %v1250_v1 = vmov 0   ;;  %s287_s13 = scalar_select %p286_p12, %s1235_s22, 1  ;;  %v1251_v4 = vmov 3   ;;  %v1252_v5 = vmov 1   ;;  %v386_v6 = vld [vmem:[%s1624_s3 + $0x48] sm:$0xff] }
  0x17   : > { %1146 = vset.pattern.permute.xlu1 %v1249_v0  ;;  %1144 = vset.pattern.permute.xlu0 %v1250_v1  ;;  %s1364_s14 = scalar_select %p288_p13, %s1358_s12, 7  ;;  %v1378_v7 = vand.u32 4294901760, %v386_v6  ;;  %v385_v12 = vld [vmem:[%s1624_s3 + $0x40] sm:$0xff]  ;;  %v384_v14 = vld [vmem:[%s1624_s3 + $0x38] sm:$0xff]  ;;  %v383_v17 = vld [vmem:[%s1624_s3 + $0x30] sm:$0xff]  ;;  %vm695_vm0 = vcmask 1044480  }
  0x18   : > { %1148 = vset.pattern.permute.xlu2 %v1250_v1  ;;  %s1045_s15 = sshll.u32 %s287_s13, 3  ;;  %v1393_v13 = vand.u32 4294901760, %v385_v12  ;;  %v1401_v16 = vand.u32 4294901760, %v384_v14  ;;  %v1412_v20 = vand.u32 4294901760, %v383_v17  ;;  %v382_v21 = vld [vmem:[%s1624_s3 + $0x28] sm:$0xff]  ;;  %v381_v26 = vld [vmem:[%s1624_s3 + $0x20] sm:$0xff] }
  0x19   : > { %s1367_s16 = sadd.s32 %s1045_s15, %s1364_s14  ;;  %v1381_v8 = vsub.f32 %v386_v6, %v1378_v7  ;;  %566 = vmatpush.msra.mxu3 %v1378_v7  ;;  %401 = vmatpush.msra.mxu0 %v1378_v7  ;;  %v1427_v25 = vand.u32 4294901760, %v382_v21  ;;  %v1444_v31 = vand.u32 4294901760, %v381_v26  ;;  %v380_v32 = vld [vmem:[%s1624_s3 + $0x18] sm:$0xff]  ;;  %v379_v38 = vld [vmem:[%s1624_s3 + $0x10] sm:$0xff]  ;;  %v378_v44 = vld [vmem:[%s1624_s3 + $0x8] sm:$0xff]  ;;  %vm688_vm5 = vcmask 171008  }
  0x1a   : > { %s1046_s17 = sshll.u32 %s1367_s16, 3  ;;  %v1399_v15 = vsub.f32 %v385_v12, %v1393_v13  ;;  %v1410_v19 = vsub.f32 %v384_v14, %v1401_v16  ;;  %v1425_v24 = vsub.f32 %v383_v17, %v1412_v20  ;;  %v1454_v36 = vand.u32 4294901760, %v380_v32  ;;  %v377_v50 = vld [vmem:[%s1624_s3] sm:$0xff]  ;;  %s1051_s16 = sshll.u32 %s1364_s14, 3 }
  0x1b   : > { %s303_s27 = scalar_lea.vmem %s1622_s1, %s1046_s17  ;;  %v445_v9 = vand.u32 4294901760, %v1381_v8  ;;  %520 = vmatpush.msra.mxu2 %v1381_v8  ;;  %568 = vmatpush.msra.mxu3 %v1393_v13  ;;  %v1440_v30 = vsub.f32 %v382_v21, %v1427_v25  ;;  %v474_v37 = vsub.f32 %v381_v26, %v1444_v31  ;;  %v1465_v42 = vand.u32 4294901760, %v379_v38  ;;  %s293_s8 = scalar_lea.vmem %s1621_s0, %s1046_s17 }
  0x1c   : > { %v317_v2 = vld [vmem:[%s303_s27] sm:$0xff]  ;;  %v318_v3 = vld [vmem:[%s303_s27 + $0x8] sm:$0xff]  ;;  %403 = vmatpush.msra.mxu0 %v1393_v13  ;;  %v451_v18 = vand.u32 4294901760, %v1399_v15  ;;  %v457_v23 = vand.u32 4294901760, %v1410_v19  ;;  %v463_v29 = vand.u32 4294901760, %v1425_v24  ;;  %v480_v41 = vsub.f32 %v380_v32, %v1454_v36  ;;  %s1062_s17 = sshll.u32 %s1235_s22, 3  ;;  %s309_s15 = scalar_lea.vmem %s1625_s4, %s1051_s16 }
  0x1d   : > { %350 = vperm.xlu1 %1146, %v317_v2   ;;  %322 = vperm.xlu0 %1144, %v317_v2   ;;  %v446_v10 = vsub.f32 %v1381_v8, %v445_v9  ;;  %v469_v35 = vand.u32 4294901760, %v1440_v30  ;;  %v475_v43 = vand.u32 4294901760, %v474_v37  ;;  %v486_v47 = vsub.f32 %v379_v38, %v1465_v42  ;;  %s920_s21 = sadd.s32 %s1062_s17, %s1358_s12  ;;  %s909_s17 = scalar_lea.sflag [#allocation3], %s282_s9 }
  0x1e   : > { %325 = vperm.xlu2 %1148, %v318_v3   ;;  %523 = vmatpush.msra.mxu2 %v1399_v15  ;;  %v452_v22 = vsub.f32 %v1399_v15, %v451_v18  ;;  %v458_v28 = vsub.f32 %v1410_v19, %v457_v23  ;;  %v464_v34 = vsub.f32 %v1425_v24, %v463_v29  ;;  %v481_v46 = vand.u32 4294901760, %v480_v41  ;;  %s1063_s27 = sshll.u32 %s920_s21, 3 }
  0x1f   : > { %v447_v11 = vand.u32 4294901760, %v446_v10  ;;  %570 = vmatpush.msra.mxu3 %v1401_v16  ;;  %405 = vmatpush.msra.mxu0 %v1401_v16  ;;  %v470_v40 = vsub.f32 %v1440_v30, %v469_v35  ;;  %v1472_v48 = vand.u32 4294901760, %v378_v44  ;;  %v476_v49 = vsub.f32 %v474_v37, %v475_v43  ;;  %s922_s30 = scalar_lea.hbm %s1626_s5, %s1063_s27  ;;  %s1173_s27 = scalar_lea.hbm %s1626_s5, 128 }
  0x20   : > { %526 = vmatpush.msra.mxu2 %v1410_v19  ;;  %v453_v27 = vand.u32 4294901760, %v452_v22  ;;  %v459_v33 = vand.u32 4294901760, %v458_v28  ;;  %v465_v39 = vand.u32 4294901760, %v464_v34  ;;  %v482_v51 = vsub.f32 %v480_v41, %v481_v46  ;;  %s925_s16 = sshll.u32 %s922_s30, 4  ;;  %s926_s16 = int_to_ptr.hbm [resolvable:$true] %s925_s16 }
  0x21   : > { %448 = vmatpush.msra.mxu1 %v447_v11  ;;  %572 = vmatpush.msra.mxu3 %v1412_v20  ;;  %v471_v45 = vand.u32 4294901760, %v470_v40  ;;  %v487_v52 = vand.u32 4294901760, %v486_v47  ;;  %v492_v53 = vsub.f32 %v378_v44, %v1472_v48  ;;  %v1480_v54 = vand.u32 4294901760, %v377_v50  ;;  %s1167_s10 = sshra.s32 %s926_s16, 4  ;;  %s1168_s10 = int_to_ptr.hbm [resolvable:$true] %s1167_s10 }
  0x22   : > { %407 = vmatpush.msra.mxu0 %v1412_v20  ;;  %529 = vmatpush.msra.mxu2 %v1425_v24  ;;  %v477_v55 = vand.u32 4294901760, %v476_v49  ;;  %v483_v56 = vand.u32 4294901760, %v482_v51  ;;  %vm387_vm8 = vcmask 654336   ;;  %v313_v49 = vld [vmem:[%s293_s8 + $0x8] sm:$0xff]  ;;  %s1169_s13 = scalar_lea.hbm %s1168_s10, 16  ;;  %p1174_p4 = scmp.lt.s32.totalorder %s1168_s10, %s1626_s5 }
  0x23   : > { %574 = vmatpush.msra.mxu3 %v1427_v25  ;;  %454 = vmatpush.msra.mxu1 %v453_v27  ;;  %v488_v57 = vsub.f32 %v486_v47, %v487_v52  ;;  %v493_v58 = vand.u32 4294901760, %v492_v53  ;;  %v498_v59 = vsub.f32 %v377_v50, %v1480_v54  ;;  %p1170_p0 = scmp.ne.s32.totalorder %s1168_s10, %s1169_s13  ;;  %p1175_p5 = scmp.lt.s32.totalorder %s1173_s27, %s1169_s13 }
  0x24   : > { %409 = vmatpush.msra.mxu0 %v1427_v25  ;;  %532 = vmatpush.msra.mxu2 %v1440_v30 }
  0x25   : > { %1147 = vset.pattern.permute.xlu1 %v1251_v4  ;;  %1145 = vset.pattern.permute.xlu0 %v1252_v5  ;;  %v489_v60 = vand.u32 4294901760, %v488_v57  ;;  %v494_v61 = vsub.f32 %v492_v53, %v493_v58  ;;  %v499_v62 = vand.u32 4294901760, %v498_v59  ;;  %p1171_p1 = pnand %p1170_p0, %p1337_p3  ;;  %p1176_p6 = por %p1175_p5, %p1174_p4 }
  0x26   : > { %364 = vperm.xlu1 %1147, %v317_v2   ;;  %336 = vperm.xlu0 %1145, %v317_v2   ;;  %v316_v2 = vld [vmem:[%s1623_s2 + $0x10] sm:$0x1f] }
  0x27   : > { %1149 = vset.pattern.permute.xlu2 %v1252_v5  ;;  %576 = vmatpush.msra.mxu3 %v1444_v31  ;;  %v495_v63 = vand.u32 4294901760, %v494_v61  ;;  %v315_v5 = vld [vmem:[%s1623_s2 + $0x8] sm:$0xff]  ;;  %p1172_p2 = pneg %p1171_p1 }
  0x28   : > { %339 = vperm.xlu2 %1149, %v318_v3   ;;  %411 = vmatpush.msra.mxu0 %v1444_v31  ;;  %v1513_v8 = vand.u32 4294901760, %v315_v5 }
  0x29   : > { %460 = vmatpush.msra.mxu1 %v459_v33  ;;  %535 = vmatpush.msra.mxu2 %v474_v37  ;;  %v312_v33 = vld [vmem:[%s293_s8] sm:$0xff]  ;;  %s284_s8 = scalar_lea.vmem [#allocation2], %s1043_s26  ;;  %p1177_p7 = pnand %p1176_p6, %p1172_p2 }
  0x2a   : > { %578 = vmatpush.msra.mxu3 %v1454_v36  ;;  %413 = vmatpush.msra.mxu0 %v1454_v36  ;;  %v1522_v11 = vsub.f32 %v315_v5, %v1513_v8  ;;  %v690_v38 = vsel %vm688_vm5, %v312_v33, 0  ;;  %s923_s12 = sshll.u32 %s284_s8, 4  ;;  %s924_s12 = int_to_ptr.vmem [resolvable:$true] %s923_s12 }
  0x2b   : > { %466 = vmatpush.msra.mxu1 %v465_v39  ;;  %538 = vmatpush.msra.mxu2 %v480_v41  ;;  %v718_v44 = vand.u32 4294901760, %v690_v38 }
  0x2c   : > { %580 = vmatpush.msra.mxu3 %v1465_v42  ;;  %415 = vmatpush.msra.mxu0 %v1465_v42  ;;  %v756_v17 = vand.u32 4294901760, %v1522_v11 }
  0x2d   : > { %472 = vmatpush.msra.mxu1 %v471_v45  ;;  %541 = vmatpush.msra.mxu2 %v486_v47 }
  0x2e   : > { %1150 = vset.pattern.permute.xlu1 %v1249_v0  ;;  %1152 = vset.pattern.permute.xlu0 %v1251_v4  ;;  %v500_v0 = vsub.f32 %v498_v59, %v499_v62 }
  0x2f   : > { %353 = vperm.xlu1 %1150, %v318_v3   ;;  %582 = vmatpush.msra.mxu3 %v1472_v48 }
  0x30   : > { %1151 = vset.pattern.permute.xlu2 %v1251_v4  ;;  %417 = vmatpush.msra.mxu0 %v1472_v48  ;;  %v501_v1 = vand.u32 4294901760, %v500_v0 }
  0x31   : > { %367 = vperm.xlu2 %1151, %v318_v3   ;;  %478 = vmatpush.msra.mxu1 %v477_v55  ;;  %v697_v3 = vsel %vm695_vm0, %v316_v2, 0  ;;  %v693_v55 = vsel %vm688_vm5, %v313_v49, 0 }
  0x32   : > { %544 = vmatpush.msra.mxu2 %v492_v53  ;;  %584 = vmatpush.msra.mxu3 %v1480_v54  ;;  %v1503_v4 = vand.u32 4294901760, %v697_v3  ;;  %v726_v61 = vand.u32 4294901760, %v693_v55 }
  0x33   : > { %419 = vmatpush.msra.mxu0 %v1480_v54  ;;  %484 = vmatpush.msra.mxu1 %v483_v56 }
  0x34   : > { %547 = vmatpush.msra.mxu2 %v498_v59 }
  0x35   : > { %607 = vmatpush.msrb.mxu0 %v445_v9  ;;  %490 = vmatpush.msra.mxu1 %v489_v60  ;;  %v314_v9 = vld [vmem:[%s1623_s2] sm:$0xff] }
  0x36   : > { %713 = vmatpush.msrb.mxu2 %v1503_v4  ;;  %v1524_v12 = vand.u32 4294901760, %v314_v9 }
  0x37   : > { %611 = vmatpush.msrb.mxu0 %v451_v18  ;;  %496 = vmatpush.msra.mxu1 %v495_v63 }
  0x38   : > { %715 = vmatpush.msrb.mxu2 %v1513_v8  ;;  %v1533_v18 = vsub.f32 %v314_v9, %v1524_v12 }
  0x39   : > { %615 = vmatpush.msrb.mxu0 %v457_v23  ;;  %502 = vmatpush.msra.mxu1 %v501_v1  ;;  %v727_v1 = vsub.f32 %v693_v55, %v726_v61  ;;  %v903_v55 = vld [vmem:[%s309_s15 + $0x8] sm:$0xff] }
  0x3a   : > { %717 = vmatpush.msrb.mxu2 %v1524_v12  ;;  %v762_v21 = vand.u32 4294901760, %v1533_v18 }
  0x3b   : > { %660 = vmatpush.msrb.mxu1 %v1378_v7  ;;  %619 = vmatpush.msrb.mxu0 %v463_v29  ;;  %v1511_v7 = vsub.f32 %v697_v3, %v1503_v4  ;;  %v1253_v29 = vmov 0.0   ;;  %v728_v5 = vand.u32 4294901760, %v727_v1 }
  0x3c   : > { %v763_v24 = vsub.f32 %v1533_v18, %v762_v21 }
  0x3d   : > { %662 = vmatpush.msrb.mxu1 %v1393_v13  ;;  %623 = vmatpush.msrb.mxu0 %v469_v35  ;;  %v750_v10 = vand.u32 4294901760, %v1511_v7  ;;  %v319_v13 = vlaneseq }
  0x3e   : > { %v764_v26 = vand.u32 4294901760, %v763_v24 }
  0x3f   : > { %664 = vmatpush.msrb.mxu1 %v1401_v16  ;;  %627 = vmatpush.msrb.mxu0 %v475_v43  ;;  %v751_v16 = vsub.f32 %v1511_v7, %v750_v10  ;;  %v320_v22 = vand.u32 127, %v319_v13 }
  0x41   : > { %666 = vmatpush.msrb.mxu1 %v1412_v20  ;;  %631 = vmatpush.msrb.mxu0 %v481_v46  ;;  %v752_v19 = vand.u32 4294901760, %v751_v16  ;;  %v757_v20 = vsub.f32 %v1522_v11, %v756_v17 }
  0x43   : > { %668 = vmatpush.msrb.mxu1 %v1427_v25  ;;  %635 = vmatpush.msrb.mxu0 %v487_v52  ;;  %v758_v23 = vand.u32 4294901760, %v757_v20 }
  0x44   : > { %753 = vmatpush.msrb.mxu3 %v752_v19 }
  0x45   : > { %670 = vmatpush.msrb.mxu1 %v1444_v31  ;;  %639 = vmatpush.msrb.mxu0 %v493_v58 }
  0x46   : > { %759 = vmatpush.msrb.mxu3 %v758_v23 }
  0x47   : > { %672 = vmatpush.msrb.mxu1 %v1454_v36  ;;  %643 = vmatpush.msrb.mxu0 %v499_v62 }
  0x48   : > { %765 = vmatpush.msrb.mxu3 %v764_v26 }
  0x49   : > { %674 = vmatpush.msrb.mxu1 %v1465_v42 }
  0x4b   : > { %676 = vmatpush.msrb.mxu1 %v1472_v48 }
  0x4d   : > { %678 = vmatpush.msrb.mxu1 %v1480_v54  ;;  %v719_v54 = vsub.f32 %v690_v38, %v718_v44 }
  0x4f   : > { %v720_v60 = vand.u32 4294901760, %v719_v54 }
  0x51   : > { %v721_v0 = vsub.f32 %v719_v54, %v720_v60 }
  0x78   : > { %v326_v6 = vpop.permute.xlu2 %325 }
  0x79   : > { %vm328_vm6 = vcmp.eq.s32.totalorder %v320_v22, %v326_v6  ;;  %v729_v6 = vsub.f32 %v727_v1, %v728_v5 }
  0x7a   : > { %v1053_v39 = vsel %vm328_vm6, 1.0, %v1253_v29 }
  0x82   : > { %v340_v25 = vpop.permute.xlu2 %339 }
  0x83   : > { %vm342_vm7 = vcmp.eq.s32.totalorder %v320_v22, %v340_v25 }
  0x84   : > { %v1055_v40 = vsel %vm342_vm7, 1.0, %v1253_v29 }
  0x85   : > { %v348_v45 = vadd.f32 %v1055_v40, %v1053_v39 }
  0x8b   : > { %v368_v36 = vpop.permute.xlu2 %367 }
  0x8c   : > { %vm370_vm9 = vcmp.eq.s32.totalorder %v320_v22, %v368_v36 }
  0x8d   : > { %v1059_v48 = vsel %vm370_vm9, 1.0, %v1253_v29 }
  0x8f   : > { %v323_v14 = vpop.permute.xlu0 %322  ;;  %v351_v15 = vpop.permute.xlu1 %350 }
  0x90   : > { %vm327_vm1 = vcmp.eq.s32.totalorder %v320_v22, %v323_v14  ;;  %vm355_vm2 = vcmp.eq.s32.totalorder %v320_v22, %v351_v15 }
  0x91   : > { %v1052_v30 = vsel %vm327_vm1, 1.0, %v1253_v29  ;;  %v1056_v34 = vsel %vm355_vm2, 1.0, %v1253_v29 }
  0x98   : > { %v337_v27 = vpop.permute.xlu0 %336  ;;  %v365_v28 = vpop.permute.xlu1 %364 }
  0x99   : > { %vm341_vm3 = vcmp.eq.s32.totalorder %v320_v22, %v337_v27  ;;  %vm369_vm4 = vcmp.eq.s32.totalorder %v320_v22, %v365_v28 }
  0x9a   : > { %v1054_v31 = vsel %vm341_vm3, 1.0, %v1253_v29  ;;  %v1058_v37 = vsel %vm369_vm4, 1.0, %v1253_v29 }
  0x9b   : > { %v347_v32 = vadd.f32 %v1054_v31, %v1052_v30 }
  0x9d   : > { %v361_v35 = vadd.f32 %v1056_v34, %v347_v32 }
  0x9f   : > { %v375_v41 = vadd.f32 %v1058_v37, %v361_v35 }
  0xa1   : > { %v389_v42 = vsel %vm387_vm8, %v375_v41, 0  ;;  %v354_v43 = vpop.permute.xlu1 %353 }
  0xa2   : > { %v420_v46 = vand.u32 4294901760, %v389_v42  ;;  %vm356_vm10 = vcmp.eq.s32.totalorder %v320_v22, %v354_v43 }
  0xa3   : > { %v1057_v47 = vsel %vm356_vm10, 1.0, %v1253_v29 }
  0xa4   : > { %v362_v50 = vadd.f32 %v1057_v47, %v348_v45  ;;  %504 = vmatmul.f32.vlgmr.msra.gmra.mxu1 %v420_v46  ;;  %v421_v51 = vsub.f32 %v389_v42, %v420_v46 }
  0xa5   : > { %888 = vmatpush.msra.mxu1 %v1503_v4 }
  0xa6   : > { %v376_v52 = vadd.f32 %v1059_v48, %v362_v50  ;;  %550 = vmatmul.f32.vlgmr.msra.gmra.mxu2 %v421_v51  ;;  %v422_v53 = vand.u32 4294901760, %v421_v51 }
  0xa7   : > { %790 = vmatpush.msra.mxu2 %v1511_v7  ;;  %890 = vmatpush.msra.mxu1 %v1513_v8  ;;  %v730_v7 = vand.u32 4294901760, %v729_v6 }
  0xa8   : > { %v392_v56 = vsel %vm387_vm8, %v376_v52, 0  ;;  %588 = vmatmul.f32.vlgmr.msra.gmra.mxu3 %v422_v53  ;;  %v423_v57 = vsub.f32 %v421_v51, %v422_v53 }
  0xa9   : > { %v428_v58 = vand.u32 4294901760, %v392_v56  ;;  %822 = vmatpush.msra.mxu3 %v1503_v4  ;;  %793 = vmatpush.msra.mxu2 %v1522_v11  ;;  %v722_v4 = vand.u32 4294901760, %v721_v0 }
  0xaa   : > { %v424_v59 = vand.u32 4294901760, %v423_v57  ;;  %892 = vmatpush.msra.mxu1 %v1524_v12 }
  0xab   : > { %v429_v62 = vsub.f32 %v392_v56, %v428_v58  ;;  %824 = vmatpush.msra.mxu3 %v1513_v8  ;;  %796 = vmatpush.msra.mxu2 %v1533_v18 }
  0xac   : > { %425 = vmatmul.f32.vlgmr.msra.gmra.mxu0 %v424_v59  ;;  %508 = vmatmul.f32.gmra.mxu1 %v428_v58 }
  0xad   : > { %v430_v63 = vand.u32 4294901760, %v429_v62  ;;  %856 = vmatpush.msra.mxu0 %v750_v10  ;;  %826 = vmatpush.msra.mxu3 %v1524_v12 }
  0xae   : > { %555 = vmatmul.f32.gmra.mxu2 %v429_v62 }
  0xaf   : > { %v431_v2 = vsub.f32 %v429_v62, %v430_v63  ;;  %860 = vmatpush.msra.mxu0 %v756_v17 }
  0xb0   : > { %594 = vmatmul.f32.gmra.mxu3 %v430_v63 }
  0xb1   : > { %v432_v3 = vand.u32 4294901760, %v431_v2  ;;  %864 = vmatpush.msra.mxu0 %v762_v21 }
  0xb4   : > { %433 = vmatmul.f32.gmra.mxu0 %v432_v3  ;;  %680 = vmatmul.f32.vlgmr.msrb.gmra.mxu1 %v420_v46 }
  0xb6   : > { %723 = vmatmul.f32.vlgmr.msrb.gmra.mxu2 %v722_v4 }
  0xb8   : > { %767 = vmatmul.f32.vlgmr.msrb.gmra.mxu3 %v718_v44 }
  0xbc   : > { %645 = vmatmul.f32.vlgmr.msrb.gmra.mxu0 %v420_v46  ;;  %684 = vmatmul.f32.gmra.mxu1 %v428_v58 }
  0xbe   : > { %731 = vmatmul.f32.gmra.mxu2 %v730_v7 }
  0xc0   : > { %771 = vmatmul.f32.gmra.mxu3 %v726_v61 }
  0xc4   : > { %649 = vmatmul.f32.gmra.mxu0 %v428_v58  ;;  %894 = vmatmul.f32.vlgmr.msra.gmra.mxu1 %v718_v44 }
  0xc6   : > { %799 = vmatmul.f32.vlgmr.msra.gmra.mxu2 %v719_v54 }
  0xc8   : > { %830 = vmatmul.f32.vlgmr.msra.gmra.mxu3 %v720_v60 }
  0xcc   : > { %866 = vmatmul.f32.vlgmr.msra.gmra.mxu0 %v718_v44  ;;  %898 = vmatmul.f32.gmra.mxu1 %v726_v61  ;;  %v902_v44 = vld [vmem:[%s309_s15] sm:$0xff] }
  0xce   : > { %804 = vmatmul.f32.gmra.mxu2 %v727_v1 }
  0xd0   : > { %836 = vmatmul.f32.gmra.mxu3 %v728_v5 }
  0xd4   : > { %870 = vmatmul.f32.gmra.mxu0 %v726_v61 }
 0x121   : > { %v505_v8 = vpop.f32.mrf.mxu1 }
 0x129   : > { %v426_v9 = vpop.f32.mrf.mxu0  ;;  %v551_v10 = vpop.f32.mrf.mxu2 }
 0x12a   : > { %v509_v12 = vpop.f32.mrf.mxu1  ;;  %v506_v15 = vadd.f32 %v505_v8, %v426_v9 }
 0x12b   : > { %v589_v11 = vpop.f32.mrf.mxu3 }
 0x12c   : > { %v552_v17 = vadd.f32 %v551_v10, %v506_v15 }
 0x12e   : > { %v590_v21 = vadd.f32 %v589_v11, %v552_v17 }
 0x131   : > { %v434_v13 = vpop.f32.mrf.mxu0  ;;  %v556_v14 = vpop.f32.mrf.mxu2 }
 0x132   : > { %v681_v19 = vpop.f32.mrf.mxu1  ;;  %v510_v22 = vadd.f32 %v509_v12, %v434_v13 }
 0x133   : > { %v595_v16 = vpop.f32.mrf.mxu3 }
 0x134   : > { %v557_v25 = vadd.f32 %v556_v14, %v510_v22 }
 0x136   : > { %v596_v29 = vadd.f32 %v595_v16, %v557_v25 }
 0x139   : > { %v646_v18 = vpop.f32.mrf.mxu0  ;;  %v724_v20 = vpop.f32.mrf.mxu2 }
 0x13a   : > { %v647_v24 = vadd.f32 %v646_v18, %v590_v21  ;;  %v685_v31 = vpop.f32.mrf.mxu1 }
 0x13b   : > { %v768_v23 = vpop.f32.mrf.mxu3 }
 0x13c   : > { %v682_v26 = vadd.f32 %v681_v19, %v647_v24 }
 0x13e   : > { %v725_v32 = vadd.f32 %v724_v20, %v682_v26 }
 0x140   : > { %v769_v34 = vadd.f32 %v768_v23, %v725_v32 }
 0x141   : > { %v650_v27 = vpop.f32.mrf.mxu0  ;;  %v732_v28 = vpop.f32.mrf.mxu2 }
 0x142   : > { %v651_v33 = vadd.f32 %v650_v27, %v596_v29  ;;  %v895_v40 = vpop.f32.mrf.mxu1 }
 0x143   : > { %v772_v30 = vpop.f32.mrf.mxu3 }
 0x144   : > { %v686_v35 = vadd.f32 %v685_v31, %v651_v33 }
 0x146   : > { %v733_v41 = vadd.f32 %v732_v28, %v686_v35 }
 0x148   : > { %v773_v45 = vadd.f32 %v772_v30, %v733_v41 }
 0x149   : > { %v800_v36 = vpop.f32.mrf.mxu2  ;;  %v867_v37 = vpop.f32.mrf.mxu0 }
 0x14a   : > { %v801_v38 = vadd.f32 %v800_v36, %v769_v34  ;;  %v899_v53 = vpop.f32.mrf.mxu1 }
 0x14b   : > { %v831_v39 = vpop.f32.mrf.mxu3 }
 0x14c   : > { %v832_v42 = vadd.f32 %v831_v39, %v801_v38 }
 0x14e   : > { %v868_v43 = vadd.f32 %v867_v37, %v832_v42 }
 0x150   : > { %v896_v46 = vadd.f32 %v895_v40, %v868_v43 }
 0x151   : > { %v805_v47 = vpop.f32.mrf.mxu2  ;;  %v871_v51 = vpop.f32.mrf.mxu0 }
 0x152   : > { %v904_v48 = vadd.f32 %v902_v44, %v896_v46  ;;  %v806_v49 = vadd.f32 %v805_v47, %v773_v45 }
 0x153   : > { %v837_v50 = vpop.f32.mrf.mxu3 }
 0x154   : > { %906 = vst [vmem:[%s284_s8] sm:$0xff] %v904_v48  ;;  %v838_v52 = vadd.f32 %v837_v50, %v806_v49 }
 0x156   : > { %v872_v54 = vadd.f32 %v871_v51, %v838_v52 }
 0x158   : > { %v900_v56 = vadd.f32 %v899_v53, %v872_v54 }
 0x15a   : > { %v905_v57 = vadd.f32 %v903_v55, %v900_v56 }
 0x15c   : > { %907 = vst [vmem:[%s284_s8 + $0x8] sm:$0xff] %v905_v57 }
 0x15d   : > { %1180 = shalt.err (!%p1177_p7)
}
 0x15e   : > { %s1254_s9 = smov 128   ;;  %s1255_s14 = smov 8  }
 0x15f   : > { %1066 = dma.vmem_to_hbm [thread:$0]  (%p1337_p3), %s924_s12, 256, %s926_s16, %s909_s17, %s1254_s9, %s1254_s9, %s1255_s14  }
 0x160 PF: > { %p1072_p9 = scmp.ge.s32.totalorder %s1247_s25, 2  ;;  %s940_s30 = sand.u32 1, %s1219_s18  }
 0x161   : > { %s941_s8 = scalar_lea.sflag [#allocation3], %s940_s30 }
 0x162   : > { %p1069_p10 = pnand %p1072_p9, %p1346_p8 }
 0x164   : > { %p1070_p11 = pneg %p1069_p10 }
 0x166   : > { %1214 = dma.done.wait (%p1070_p11), %s941_s8, 256  }
 0x167   : > { %1216 = vsyncadd (%p1070_p11), %s941_s8, 4294967040  ;;  %s18_s25 = sadd.s32 1, %s1247_s25   ;;  %s1629_s18 = smov %s1223_s19 }
 0x168   : > { %p15_p12 = scmp.ge.s32.totalorder %s18_s25, 10   ;;  %s1630_s19 = smov %s1227_s20 }
 0x169   : > { %s1631_s20 = smov %s1355_s11  ;;  %s1632_s21 = smov %s1239_s23 }
 0x16a   : > { %s1633_s22 = smov %s1243_s24  ;;  %s1634_s23 = smov %s1637_s28 }
 0x16b   : > { %s1635_s24 = smov %s1641_s29  ;;  %17 = sbr.rel (!%p15_p12) target bundleno = 5 (0x5), region = 81 }
 0x170   :  { %947 = vsyncpa [#allocation3], 1 }
 0x171   :  { %949 = vsyncpa [#allocation3 + $0x1], 1 }

</bundles_post_ra>
